<compile_context>
chip_gen: v5e
topology: v5e:2x2
jax: 0.10.0
libtpu: 0.0.40
codegen_flags: <defaults>
</compile_context>

<pallas_src>
import jax
import jax.numpy as jnp
from jax.experimental import pallas as pl
from jax.experimental.pallas import tpu as pltpu


_LANE_TILE_TARGET = 2048          # multiple of 128; ragged tail handled by cdiv + masked stores


def _sublane_multiple(dtype):
    # f32 -> 8, bf16 -> 16, int8/fp8 -> 32 (sublane packing of narrow dtypes)
    return max(8, 32 // jnp.dtype(dtype).itemsize)


def _round_up(x, m):
    return (x + m - 1) // m * m


def _vmem_capacity_bytes():
    try:
        return int(pltpu.get_tpu_info().vmem_capacity_bytes)
    except Exception:
        return 64 << 20           # conservative fallback: v7x per-TC VMEM


def _make_kernel(compute_dtype):
    def kernel(x_ref, a_ref, b_ref, o_ref):
        x = x_ref[...].astype(compute_dtype)
        a = a_ref[...].astype(compute_dtype)     # (row_tile, 1) -> broadcasts over lanes
        b = b_ref[...].astype(compute_dtype)
        o_ref[...] = (a * x + b).astype(o_ref.dtype)
    return kernel


def channel_wise_affine(x, a, b):
    """x: (N, C, H, W); a, b: (1, C, 1, 1). Returns a * x + b (PyTorch broadcast semantics)."""
    N, C, H, W = x.shape
    assert a.shape == (1, C, 1, 1) and b.shape == (1, C, 1, 1)
    rows, hw = N * C, H * W

    out_dtype = jnp.result_type(x.dtype, a.dtype, b.dtype)
    param_dtype = jnp.result_type(a.dtype, b.dtype)
    x_item = jnp.dtype(x.dtype).itemsize
    o_item = jnp.dtype(out_dtype).itemsize
    p_item = jnp.dtype(param_dtype).itemsize
    item = max(x_item, o_item)
    sub = max(_sublane_multiple(x.dtype), _sublane_multiple(out_dtype))

    # ---- generation-aware block / VMEM budget ------------------------------------
    vmem_cap = _vmem_capacity_bytes()
    if vmem_cap <= (64 << 20):            # v7x-class: 64 MiB per TC
        target_block_bytes = 4 << 20
        vmem_limit_cap = min(44 << 20, vmem_cap * 3 // 4)
    else:                                  # v6e / v5e: 128 MiB
        target_block_bytes = 8 << 20
        vmem_limit_cap = min(96 << 20, vmem_cap * 3 // 4)

    # ---- tiling: fixed near-target tiles, cdiv grid, masked ragged tail ----------
    if hw <= _LANE_TILE_TARGET:
        lane_tile = hw                     # full-dim lane block is always legal
    else:
        lane_tile = _LANE_TILE_TARGET      # multiple of 128; last block masked
    lane_pad = _round_up(lane_tile, 128)

    row_target = max(sub, (target_block_bytes // (item * lane_pad)) // sub * sub)
    row_tile = rows if rows <= row_target else row_target

    # v7x megacore: make sure the (parallel) row axis has >= 2 blocks when splittable.
    if pl.cdiv(rows, row_tile) < 2 and rows > sub:
        row_tile = max(sub, _round_up((row_tile + 1) // 2, sub))

    grid = (pl.cdiv(rows, row_tile), pl.cdiv(hw, lane_tile))

    # ---- data layout: lane-dense slab + per-(n, c)-row param columns -------------
    x2 = x.reshape(rows, hw)
    a_rows = jnp.broadcast_to(a.reshape(1, C), (N, C)).reshape(rows, 1).astype(param_dtype)
    b_rows = jnp.broadcast_to(b.reshape(1, C), (N, C)).reshape(rows, 1).astype(param_dtype)

    # ---- explicit VMEM budget (double-buffered x/out blocks + streamed params) ---
    row_pad_x = _round_up(row_tile, _sublane_multiple(x.dtype))
    row_pad_o = _round_up(row_tile, _sublane_multiple(out_dtype))
    row_pad_p = _round_up(row_tile, _sublane_multiple(param_dtype))
    needed = (2 * lane_pad * (row_pad_x * x_item + row_pad_o * o_item)
              + 2 * 2 * row_pad_p * 128 * p_item)
    vmem_limit = int(max(16 << 20, min(needed * 3 // 2 + (2 << 20), vmem_limit_cap)))

    # bf16-native compute when everything is bf16 (v6e/v7x VPU); otherwise f32.
    compute_dtype = (jnp.bfloat16
                     if (x.dtype == jnp.bfloat16 and param_dtype == jnp.bfloat16)
                     else jnp.float32)

    out2 = pl.pallas_call(
        _make_kernel(compute_dtype),
        out_shape=jax.ShapeDtypeStruct((rows, hw), out_dtype),
        grid_spec=pltpu.PrefetchScalarGridSpec(
            num_scalar_prefetch=0,
            grid=grid,
            in_specs=[
                pl.BlockSpec((row_tile, lane_tile), lambda i, j: (i, j)),
                pl.BlockSpec((row_tile, 1), lambda i, j: (i, 0)),
                pl.BlockSpec((row_tile, 1), lambda i, j: (i, 0)),
            ],
            out_specs=pl.BlockSpec((row_tile, lane_tile), lambda i, j: (i, j)),
        ),
        compiler_params=pltpu.CompilerParams(
            # Both axes are independent elementwise tiles -> shard across TCs.
            dimension_semantics=("parallel", "parallel"),
            vmem_limit_bytes=vmem_limit,
        ),
    )(x2, a_rows, b_rows)

    return out2.reshape(N, C, H, W)


if __name__ == "__main__":
    key = jax.random.PRNGKey(0)
    kx, ka, kb = jax.random.split(key, 3)

    N, C, H, W = 2, 4, 16, 16
    x = jax.random.normal(kx, (N, C, H, W), dtype=jnp.float32)

    # Module defaults are a=ones, b=zeros; perturb so the kernel is actually exercised.
    a = jnp.ones((1, C, 1, 1), dtype=jnp.float32) + 0.1 * jax.random.normal(ka, (1, C, 1, 1))
    b = jnp.zeros((1, C, 1, 1), dtype=jnp.float32) + 0.1 * jax.random.normal(kb, (1, C, 1, 1))

    out = channel_wise_affine(x, a, b)
    out = jax.block_until_ready(out)

    # Reference check against plain-JAX broadcast semantics (matches PyTorch).
    ref = a * x + b
    assert out.shape == x.shape and out.dtype == x.dtype
    assert jnp.allclose(out, ref, atol=1e-6, rtol=1e-6)

    print("KERNEL_OK")
</pallas_src>

<mosaic_0001>
module attributes {stable_mosaic.version = 11 : i64} {
  func.func @kernel(%arg0: i32, %arg1: i32, %arg2: memref<8x256xf32, #tpu.memory_space<vmem>>, %arg3: memref<8x1xf32, #tpu.memory_space<vmem>>, %arg4: memref<8x1xf32, #tpu.memory_space<vmem>>, %arg5: memref<8x256xf32, #tpu.memory_space<vmem>>) attributes {dimension_semantics = [#tpu.dimension_semantics<parallel>, #tpu.dimension_semantics<parallel>], iteration_bounds = array<i64: 1, 1>, scalar_prefetch = 0 : i64, scratch_operands = 0 : i64, tpu.core_type = #tpu.core_type<tc>, window_params = [{transform_indices = @transform_0, window_bounds = array<i64: 8, 256>}, {transform_indices = @transform_1, window_bounds = array<i64: 8, 1>}, {transform_indices = @transform_2, window_bounds = array<i64: 8, 1>}, {transform_indices = @transform_3, window_bounds = array<i64: 8, 256>}]} {
    %c0 = arith.constant 0 : index
    %c0_0 = arith.constant 0 : index
    %0 = vector.load %arg2[%c0, %c0_0] : memref<8x256xf32, #tpu.memory_space<vmem>>, vector<8x256xf32>
    %c0_1 = arith.constant 0 : index
    %c0_2 = arith.constant 0 : index
    %1 = vector.load %arg3[%c0_1, %c0_2] : memref<8x1xf32, #tpu.memory_space<vmem>>, vector<8x1xf32>
    %c0_3 = arith.constant 0 : index
    %c0_4 = arith.constant 0 : index
    %2 = vector.load %arg4[%c0_3, %c0_4] : memref<8x1xf32, #tpu.memory_space<vmem>>, vector<8x1xf32>
    %3 = vector.broadcast %1 : vector<8x1xf32> to vector<8x256xf32>
    %4 = arith.mulf %3, %0 : vector<8x256xf32>
    %5 = vector.broadcast %2 : vector<8x1xf32> to vector<8x256xf32>
    %6 = arith.addf %4, %5 : vector<8x256xf32>
    %c0_5 = arith.constant 0 : index
    %c0_6 = arith.constant 0 : index
    %7 = vector.load %arg5[%c0_5, %c0_6] : memref<8x256xf32, #tpu.memory_space<vmem>>, vector<8x256xf32>
    tpu.vector_store %arg5[%c0_5, %c0_6], %6 {strides = array<i32>} : memref<8x256xf32, #tpu.memory_space<vmem>>, vector<8x256xf32>,
    return
  }
  func.func @transform_0(%arg0: i32, %arg1: i32) -> (i32, i32) {
    %c0_i32 = arith.constant 0 : i32
    return %arg0, %arg1 : i32, i32
  }
  func.func @transform_1(%arg0: i32, %arg1: i32) -> (i32, i32) {
    %c0_i32 = arith.constant 0 : i32
    %c0_i32_0 = arith.constant 0 : i32
    return %arg0, %c0_i32 : i32, i32
  }
  func.func @transform_2(%arg0: i32, %arg1: i32) -> (i32, i32) {
    %c0_i32 = arith.constant 0 : i32
    %c0_i32_0 = arith.constant 0 : i32
    return %arg0, %c0_i32 : i32, i32
  }
  func.func @transform_3(%arg0: i32, %arg1: i32) -> (i32, i32) {
    %c0_i32 = arith.constant 0 : i32
    return %arg0, %arg1 : i32, i32
  }
}

</mosaic_0001>

<bundles_post_ra>
// kernel: tpu_custom_call.1
= control target key start
LH: loop header
LB: loop body
LE: loop exit
PB: predicated region body
PF: predicated region fallthrough
CT: control target
= control target key end

     0   :  { %s117_s0 = inlined_call_operand.vmem [shape: f32[8,256], index: 0, kind: input, shape index: {}]   ;;  %s118_s1 = inlined_call_operand.vmem [shape: f32[8,1], index: 1, kind: input, shape index: {}]   ;;  %s119_s2 = inlined_call_operand.vmem [shape: f32[8,1], index: 2, kind: input, shape index: {}]   ;;  %s120_s3 = inlined_call_operand.hbm [shape: f32[8,256], index: 3, kind: output, shape index: {}]  }
   0x1   :  { %v17_v0 = vld [vmem:[%s118_s1] sm:$0xff] }
   0x2   :  { %8 = vsyncpa [#allocation3], 0  ;;  %v80_v1 = vmov 0   ;;  %v18_v2 = vld [vmem:[%s119_s2] sm:$0xff]  ;;  %v16_v5 = vld [vmem:[%s117_s0 + $0x8] sm:$0xff]  ;;  %s81_s1 = smov [#allocation2]  }
   0x3   :  { %53 = vset.pattern.permute.xlu0 %v80_v1  ;;  %v15_v4 = vld [vmem:[%s117_s0] sm:$0xff]  ;;  %s40_s20 = sshll.u32 %s81_s1, 4  ;;  %s42_s23 = sshll.u32 %s120_s3, 4  ;;  %s41_s20 = int_to_ptr.vmem [resolvable:$true] %s40_s20  ;;  %s43_s23 = int_to_ptr.hbm [resolvable:$true] %s42_s23 }
   0x4   :  { %21 = vperm.xlu0 %53, %v17_v0  }
   0xc   :  { %28 = vperm.xlu0 %53, %v18_v2  }
  0x76   :  { %v22_v3 = vpop.permute.xlu0 %21 }
  0x77   :  { %v24_v6 = vmul.f32 %v22_v3, %v15_v4  ;;  %v25_v7 = vmul.f32 %v22_v3, %v16_v5 }
  0x7e   :  { %v29_v8 = vpop.permute.xlu0 %28 }
  0x7f   :  { %v31_v9 = vadd.f32 %v29_v8, %v24_v6  ;;  %v32_v10 = vadd.f32 %v29_v8, %v25_v7 }
  0x81   :  { %33 = vst [vmem:[#allocation2] sm:$0xff] %v31_v9 }
  0x82   :  { %34 = vst [vmem:[#allocation2 + $0x8] sm:$0xff] %v32_v10 }
  0x83   :  { %45 = dma.vmem_to_hbm [thread:$0]  %s41_s20, 256, %s43_s23, [#allocation3]  }
  0x84   :  { %78 = dma.done.wait [#allocation3], 256  }
  0x85   :  { %79 = vsyncadd [#allocation3], 4294967040 }
  0x86   :  { %50 = vsyncpa [#allocation3], 1 }

</bundles_post_ra>
